<compile_context>
chip_gen: v5e
topology: v5e:2x2
jax: 0.10.0
libtpu: 0.0.40
codegen_flags: <defaults>
</compile_context>

<pallas_src>
import functools

import jax
import jax.numpy as jnp
from jax import lax
from jax.experimental import pallas as pl
from jax.experimental.pallas import tpu as pltpu

LANES = 128
MAX_TILE_ROWS = 8192                  # (8192,128) f32 block = 4 MiB per input per buffer
VMEM_LIMIT_BYTES = 32 * 1024 * 1024   # covers 2 inputs x 2 buffers + headroom on all gens


def _num_tensorcores():
    """2 TensorCores per chip on v7x, 1 on v5e/v6e. Defaults to 1."""
    try:
        kind = jax.devices()[0].device_kind.lower()
    except Exception:
        return 1
    return 2 if "v7" in kind else 1


def _dice_partial_kernel(pred_ref, target_ref, out_ref,
                         acc_pt, acc_s,
                         *, steps_per_core, tile_rows, n_rows, needs_mask):
    """Per-core partial sums over (tile_rows, 128) blocks.

    out_ref row c (SMEM, (1,2) f32):
      [0, 0] = sum(pred * target)           (intersection)
      [0, 1] = sum(pred) + sum(target)      (fused denominator sum)

    Accumulators are vreg-sized (8,128) f32; each step reduces the input tile
    to vreg shape in registers (pure VALU tree-add), so accumulator
    read-modify-write traffic does not scale with tile_rows.
    """
    c = pl.program_id(0)   # core axis (size 1 on v5e/v6e, 2 on v7x)
    s = pl.program_id(1)   # sequential reduction axis

    @pl.when(s == 0)
    def _init():
        acc_pt[...] = jnp.zeros_like(acc_pt)
        acc_s[...] = jnp.zeros_like(acc_s)

    p = pred_ref[...].astype(jnp.float32)
    t = target_ref[...].astype(jnp.float32)

    def accumulate(pv, tv):
        # (tile_rows,128) -> (tile_rows//8, 8, 128): vreg-aligned, no copy.
        acc_pt[...] += (pv * tv).reshape(-1, 8, LANES).sum(axis=0)
        acc_s[...] += (pv + tv).reshape(-1, 8, LANES).sum(axis=0)

    if needs_mask:
        # Logical (unclamped) block id; rows past the real data are masked.
        # Phantom blocks (clamped in the index_map) have valid <= 0 => all masked.
        b = c * steps_per_core + s
        valid = n_rows - b * tile_rows

        @pl.when(valid >= tile_rows)
        def _full():
            accumulate(p, t)

        @pl.when(valid < tile_rows)
        def _ragged():
            row_ids = lax.broadcasted_iota(jnp.int32, p.shape, 0)
            m = row_ids < valid
            # Select (not multiply): garbage/NaN in padded rows is discarded.
            accumulate(jnp.where(m, p, 0.0), jnp.where(m, t, 0.0))
    else:
        accumulate(p, t)

    @pl.when(s == pl.num_programs(1) - 1)
    def _finalize():
        out_ref[0, 0] = jnp.sum(acc_pt[...])
        out_ref[0, 1] = jnp.sum(acc_s[...])


def dice_loss(pred, target, smooth=1.0):
    """Pallas TPU implementation of DiceLoss.forward. Returns an f32 scalar."""
    assert pred.shape == target.shape, "pred/target shapes must match"

    # Flatten in native dtype (same element order as torch .view(-1)).
    pred_flat = pred.reshape(-1)
    target_flat = target.reshape(-1)
    n = pred_flat.shape[0]

    rem = n % LANES
    n_main = n - rem

    inter = jnp.float32(0.0)
    denom = jnp.float32(0.0)   # pred.sum() + target.sum()

    if n_main > 0:
        n_rows = n_main // LANES
        p2d = pred_flat[:n_main].reshape(n_rows, LANES)
        t2d = target_flat[:n_main].reshape(n_rows, LANES)

        # 8-aligned block rows (Pallas pads the array; pad rows are masked in-kernel).
        tile_rows = min(-(-n_rows // 8) * 8, MAX_TILE_ROWS)
        num_tiles = -(-n_rows // tile_rows)          # ceil div

        ncores = min(_num_tensorcores(), num_tiles)  # 1 on v5e/v6e, up to 2 on v7x
        steps_per_core = -(-num_tiles // ncores)     # ceil div
        padded_tiles = steps_per_core * ncores
        needs_mask = (padded_tiles * tile_rows) != n_rows
        last_block = num_tiles - 1

        def in_map(c, s):
            # Clamp phantom blocks to the last real block (kernel masks them).
            return (jnp.minimum(c * steps_per_core + s, last_block), 0)

        kernel = functools.partial(
            _dice_partial_kernel,
            steps_per_core=steps_per_core,
            tile_rows=tile_rows,
            n_rows=n_rows,
            needs_mask=needs_mask,
        )

        if ncores > 1:
            # v7x: force a real 2-TensorCore split of the leading axis.
            dim_sem = (pltpu.CORE_PARALLEL, pltpu.ARBITRARY)
        else:
            dim_sem = (pltpu.ARBITRARY, pltpu.ARBITRARY)

        partials = pl.pallas_call(
            kernel,
            out_shape=jax.ShapeDtypeStruct((ncores, 2), jnp.float32),
            grid_spec=pltpu.PrefetchScalarGridSpec(
                num_scalar_prefetch=0,
                grid=(ncores, steps_per_core),
                in_specs=[
                    pl.BlockSpec((tile_rows, LANES), in_map),
                    pl.BlockSpec((tile_rows, LANES), in_map),
                ],
                out_specs=pl.BlockSpec(
                    (1, 2), lambda c, s: (c, 0),
                    memory_space=pltpu.MemorySpace.SMEM),
                scratch_shapes=[
                    pltpu.VMEM((8, LANES), jnp.float32),
                    pltpu.VMEM((8, LANES), jnp.float32),
                ],
            ),
            compiler_params=pltpu.CompilerParams(
                dimension_semantics=dim_sem,
                vmem_limit_bytes=VMEM_LIMIT_BYTES),
        )(p2d, t2d)

        inter = inter + jnp.sum(partials[:, 0])
        denom = denom + jnp.sum(partials[:, 1])

    if rem > 0:
        # Sub-128-element ragged tail: negligible, handled in plain JAX.
        pt = pred_flat[n_main:].astype(jnp.float32)
        tt = target_flat[n_main:].astype(jnp.float32)
        inter = inter + jnp.sum(pt * tt)
        denom = denom + jnp.sum(pt) + jnp.sum(tt)

    smooth = jnp.float32(smooth)
    dice = (2.0 * inter + smooth) / (denom + smooth)
    return (1.0 - dice).astype(jnp.float32)


if __name__ == "__main__":
    key = jax.random.PRNGKey(0)
    k1, k2 = jax.random.split(key)

    # Small shapes consistent with a segmentation head: NCHW = [2, 4, 16, 16].
    pred = jax.nn.sigmoid(jax.random.normal(k1, (2, 4, 16, 16), dtype=jnp.float32))
    target = (jax.random.uniform(k2, (2, 4, 16, 16)) > 0.5).astype(jnp.float32)

    loss = dice_loss(pred, target, smooth=1.0)
    loss = jax.block_until_ready(loss)

    # Pure-JAX reference check.
    p = pred.reshape(-1)
    t = target.reshape(-1)
    inter = jnp.sum(p * t)
    ref = 1.0 - (2.0 * inter + 1.0) / (jnp.sum(p) + jnp.sum(t) + 1.0)
    assert jnp.allclose(loss, ref, rtol=1e-5, atol=1e-6), (loss, ref)

    print("KERNEL_OK")
</pallas_src>

<mosaic_0001>
module attributes {stable_mosaic.version = 11 : i64} {
  func.func @_dice_partial_kernel(%arg0: i32, %arg1: i32, %arg2: memref<16x128xf32, #tpu.memory_space<vmem>>, %arg3: memref<16x128xf32, #tpu.memory_space<vmem>>, %arg4: memref<1x2xf32, #tpu.memory_space<smem>>, %arg5: memref<8x128xf32, #tpu.memory_space<vmem>>, %arg6: memref<8x128xf32, #tpu.memory_space<vmem>>) attributes {dimension_semantics = [#tpu.dimension_semantics<arbitrary>, #tpu.dimension_semantics<arbitrary>], iteration_bounds = array<i64: 1, 1>, scalar_prefetch = 0 : i64, scratch_operands = 2 : i64, tpu.core_type = #tpu.core_type<tc>, window_params = [{transform_indices = @transform_0, window_bounds = array<i64: 16, 128>}, {transform_indices = @transform_1, window_bounds = array<i64: 16, 128>}, {transform_indices = @transform_2, window_bounds = array<i64: 1, 2>}]} {
    %c0_i32 = arith.constant 0 : i32
    %0 = arith.cmpi eq, %arg1, %c0_i32 : i32
    %1 = arith.extui %0 : i1 to i32
    %c0_i32_0 = arith.constant 0 : i32
    %2 = arith.cmpi ne, %1, %c0_i32_0 : i32
    scf.if %2 {
      %cst_15 = arith.constant 0.000000e+00 : f32
      %20 = vector.broadcast %cst_15 : f32 to vector<8x128xf32>
      %c0_16 = arith.constant 0 : index
      %c0_17 = arith.constant 0 : index
      %21 = vector.load %arg5[%c0_16, %c0_17] : memref<8x128xf32, #tpu.memory_space<vmem>>, vector<8x128xf32>
      tpu.vector_store %arg5[%c0_16, %c0_17], %20 {strides = array<i32>} : memref<8x128xf32, #tpu.memory_space<vmem>>, vector<8x128xf32>,
      %cst_18 = arith.constant 0.000000e+00 : f32
      %22 = vector.broadcast %cst_18 : f32 to vector<8x128xf32>
      %c0_19 = arith.constant 0 : index
      %c0_20 = arith.constant 0 : index
      %23 = vector.load %arg6[%c0_19, %c0_20] : memref<8x128xf32, #tpu.memory_space<vmem>>, vector<8x128xf32>
      tpu.vector_store %arg6[%c0_19, %c0_20], %22 {strides = array<i32>} : memref<8x128xf32, #tpu.memory_space<vmem>>, vector<8x128xf32>,
    } else {
    }
    %c0 = arith.constant 0 : index
    %c0_1 = arith.constant 0 : index
    %3 = vector.load %arg2[%c0, %c0_1] : memref<16x128xf32, #tpu.memory_space<vmem>>, vector<16x128xf32>
    %c0_2 = arith.constant 0 : index
    %c0_3 = arith.constant 0 : index
    %4 = vector.load %arg3[%c0_2, %c0_3] : memref<16x128xf32, #tpu.memory_space<vmem>>, vector<16x128xf32>
    %c0_4 = arith.constant 0 : index
    %c0_5 = arith.constant 0 : index
    %5 = vector.load %arg5[%c0_4, %c0_5] : memref<8x128xf32, #tpu.memory_space<vmem>>, vector<8x128xf32>
    %6 = arith.mulf %3, %4 : vector<16x128xf32>
    %7 = vector.shape_cast %6 : vector<16x128xf32> to vector<2x8x128xf32>
    %cst = arith.constant dense<0.000000e+00> : vector<8x128xf32>
    %8 = vector.multi_reduction <add>, %7, %cst [0] : vector<2x8x128xf32> to vector<8x128xf32>
    %9 = arith.addf %5, %8 : vector<8x128xf32>
    %c0_6 = arith.constant 0 : index
    %c0_7 = arith.constant 0 : index
    %10 = vector.load %arg5[%c0_6, %c0_7] : memref<8x128xf32, #tpu.memory_space<vmem>>, vector<8x128xf32>
    tpu.vector_store %arg5[%c0_6, %c0_7], %9 {strides = array<i32>} : memref<8x128xf32, #tpu.memory_space<vmem>>, vector<8x128xf32>,
    %c0_8 = arith.constant 0 : index
    %c0_9 = arith.constant 0 : index
    %11 = vector.load %arg6[%c0_8, %c0_9] : memref<8x128xf32, #tpu.memory_space<vmem>>, vector<8x128xf32>
    %12 = arith.addf %3, %4 : vector<16x128xf32>
    %13 = vector.shape_cast %12 : vector<16x128xf32> to vector<2x8x128xf32>
    %cst_10 = arith.constant dense<0.000000e+00> : vector<8x128xf32>
    %14 = vector.multi_reduction <add>, %13, %cst_10 [0] : vector<2x8x128xf32> to vector<8x128xf32>
    %15 = arith.addf %11, %14 : vector<8x128xf32>
    %c0_11 = arith.constant 0 : index
    %c0_12 = arith.constant 0 : index
    %16 = vector.load %arg6[%c0_11, %c0_12] : memref<8x128xf32, #tpu.memory_space<vmem>>, vector<8x128xf32>
    tpu.vector_store %arg6[%c0_11, %c0_12], %15 {strides = array<i32>} : memref<8x128xf32, #tpu.memory_space<vmem>>, vector<8x128xf32>,
    %c0_i32_13 = arith.constant 0 : i32
    %17 = arith.cmpi eq, %arg1, %c0_i32_13 : i32
    %18 = arith.extui %17 : i1 to i32
    %c0_i32_14 = arith.constant 0 : i32
    %19 = arith.cmpi ne, %18, %c0_i32_14 : i32
    scf.if %19 {
      %c0_15 = arith.constant 0 : index
      %c0_16 = arith.constant 0 : index
      %20 = vector.load %arg5[%c0_15, %c0_16] : memref<8x128xf32, #tpu.memory_space<vmem>>, vector<8x128xf32>
      %21 = vector.shape_cast %20 : vector<8x128xf32> to vector<1x8x128xf32>
      %cst_17 = arith.constant dense<0.000000e+00> : vector<1xf32>
      %22 = vector.multi_reduction <add>, %21, %cst_17 [1, 2] : vector<1x8x128xf32> to vector<1xf32>
      %23 = vector.shape_cast %22 : vector<1xf32> to vector<1x1x1xf32>
      %24 = vector.extract %23[0, 0, 0] : f32 from vector<1x1x1xf32>
      %c0_18 = arith.constant 0 : index
      %c0_19 = arith.constant 0 : index
      %25 = memref.load %arg4[%c0_18, %c0_19] : memref<1x2xf32, #tpu.memory_space<smem>>
      memref.store %24, %arg4[%c0_18, %c0_19] : memref<1x2xf32, #tpu.memory_space<smem>>
      %c0_20 = arith.constant 0 : index
      %c0_21 = arith.constant 0 : index
      %26 = vector.load %arg6[%c0_20, %c0_21] : memref<8x128xf32, #tpu.memory_space<vmem>>, vector<8x128xf32>
      %27 = vector.shape_cast %26 : vector<8x128xf32> to vector<1x8x128xf32>
      %cst_22 = arith.constant dense<0.000000e+00> : vector<1xf32>
      %28 = vector.multi_reduction <add>, %27, %cst_22 [1, 2] : vector<1x8x128xf32> to vector<1xf32>
      %29 = vector.shape_cast %28 : vector<1xf32> to vector<1x1x1xf32>
      %30 = vector.extract %29[0, 0, 0] : f32 from vector<1x1x1xf32>
      %c0_23 = arith.constant 0 : index
      %c1 = arith.constant 1 : index
      %31 = memref.load %arg4[%c0_23, %c1] : memref<1x2xf32, #tpu.memory_space<smem>>
      memref.store %30, %arg4[%c0_23, %c1] : memref<1x2xf32, #tpu.memory_space<smem>>
    } else {
    }
    return
  }
  func.func @transform_0(%arg0: i32, %arg1: i32) -> (i32, i32) {
    %c1_i32 = arith.constant 1 : i32
    %0 = arith.muli %arg0, %c1_i32 : i32
    %1 = arith.addi %0, %arg1 : i32
    %c0_i32 = arith.constant 0 : i32
    %2 = arith.minsi %1, %c0_i32 : i32
    %c0_i32_0 = arith.constant 0 : i32
    %c0_i32_1 = arith.constant 0 : i32
    return %2, %c0_i32_0 : i32, i32
  }
  func.func @transform_1(%arg0: i32, %arg1: i32) -> (i32, i32) {
    %c1_i32 = arith.constant 1 : i32
    %0 = arith.muli %arg0, %c1_i32 : i32
    %1 = arith.addi %0, %arg1 : i32
    %c0_i32 = arith.constant 0 : i32
    %2 = arith.minsi %1, %c0_i32 : i32
    %c0_i32_0 = arith.constant 0 : i32
    %c0_i32_1 = arith.constant 0 : i32
    return %2, %c0_i32_0 : i32, i32
  }
  func.func @transform_2(%arg0: i32, %arg1: i32) -> (i32, i32) {
    %c0_i32 = arith.constant 0 : i32
    %c0_i32_0 = arith.constant 0 : i32
    return %arg0, %c0_i32 : i32, i32
  }
}

</mosaic_0001>

<bundles_post_ra>
// kernel: tpu_custom_call.1
= control target key start
LH: loop header
LB: loop body
LE: loop exit
PB: predicated region body
PF: predicated region fallthrough
CT: control target
= control target key end

     0   :  { %7 = vsyncpa [#allocation5], 0  ;;  %s238_s0 = inlined_call_operand.hbm [shape: f32[16,128], index: 0, kind: input, shape index: {}]   ;;  %s239_s1 = inlined_call_operand.hbm [shape: f32[16,128], index: 1, kind: input, shape index: {}]   ;;  %s240_s2 = inlined_call_operand.hbm [shape: f32[1,2], index: 2, kind: output, shape index: {}]  }
   0x1   :  { %8 = vsyncpa [#allocation8], 0 }
   0x2   :  { %9 = vsyncpa [#allocation6], 0  ;;  %s20_s11 = sshll.u32 %s238_s0, 4  ;;  %s209_s12 = smov [#allocation4]   ;;  %s21_s11 = int_to_ptr.hbm [resolvable:$true] %s20_s11 }
   0x3   :  { %s22_s13 = sshll.u32 %s209_s12, 4  ;;  %s39_s16 = sshll.u32 %s239_s1, 4  ;;  %s23_s13 = int_to_ptr.vmem [resolvable:$true] %s22_s13  ;;  %s40_s16 = int_to_ptr.hbm [resolvable:$true] %s39_s16 }
   0x4   :  { %s210_s17 = smov 128   ;;  %s211_s18 = smov 8  }
   0x5   :  { %28 = dma.hbm_to_vmem [thread:$0]  %s21_s11, 256, %s23_s13, [#allocation5], %s210_s17, %s210_s17, %s211_s18  }
   0x6   :  { %s212_s19 = smov [#allocation7]  }
   0x7   :  { %s41_s20 = sshll.u32 %s212_s19, 4  ;;  %s42_s20 = int_to_ptr.vmem [resolvable:$true] %s41_s20 }
   0x8   :  { %47 = dma.hbm_to_vmem [thread:$0]  %s40_s16, 256, %s42_s20, [#allocation8], %s210_s17, %s210_s17, %s211_s18  }
   0x9   :  { %203 = dma.done.wait [#allocation5], 256  }
   0xa   :  { %204 = vsyncadd [#allocation5], 4294967040 }
   0xb   :  { %205 = dma.done.wait [#allocation8], 256  }
   0xc   :  { %206 = vsyncadd [#allocation8], 4294967040  ;;  %v70_v0 = vld [vmem:[#allocation4] sm:$0xff]  ;;  %v71_v1 = vld [vmem:[#allocation4 + $0x8] sm:$0xff]  ;;  %s118_s22 = sshll.u32 %s240_s2, 4  ;;  %s213_s24 = smov [#allocation9]   ;;  %s119_s22 = int_to_ptr.hbm [resolvable:$true] %s118_s22 }
   0xd   :  { %v72_v2 = vld [vmem:[#allocation7] sm:$0xff]  ;;  %v73_v3 = vld [vmem:[#allocation7 + $0x8] sm:$0xff] }
   0xe   :  { %v75_v4 = vmul.f32 %v72_v2, %v70_v0  ;;  %v76_v5 = vmul.f32 %v73_v3, %v71_v1  ;;  %v81_v7 = vadd.f32 %v72_v2, %v70_v0  ;;  %v82_v8 = vadd.f32 %v73_v3, %v71_v1 }
  0x10   :  { %v77_v6 = vadd.f32 %v76_v5, %v75_v4  ;;  %v83_v9 = vadd.f32 %v82_v8, %v81_v7 }
  0x12   :  { %90 = vadd.xlane.f32.xlu0 %v77_v6 }
  0x1a   :  { %102 = vadd.xlane.f32.xlu0 %v83_v9 }
  0x85   :  { %v91_v10 = vpop.xlane.xlu0 %90 }
  0x86   :  { %v92_v11 = vrot.slane %v91_v10, 4 }
  0x88   :  { %v93_v12 = vadd.f32 %v92_v11, %v91_v10 }
  0x8a   :  { %v94_v13 = vrot.slane %v93_v12, 2 }
  0x8c   :  { %v95_v14 = vadd.f32 %v94_v13, %v93_v12 }
  0x8d   :  { %v103_v15 = vpop.xlane.xlu0 %102 }
  0x8e   :  { %v104_v16 = vrot.slane %v103_v15, 4  ;;  %v96_v17 = vrot.slane %v95_v14, 1 }
  0x90   :  { %v105_v18 = vadd.f32 %v104_v16, %v103_v15  ;;  %v97_v19 = vadd.f32 %v96_v17, %v95_v14 }
  0x92   :  { %v106_v20 = vrot.slane %v105_v18, 2  ;;  %134 = vpush %v97_v19 }
  0x94   :  { %v107_v21 = vadd.f32 %v106_v20, %v105_v18 }
  0x96   :  { %v108_v22 = vrot.slane %v107_v21, 1 }
  0x98   :  { %v109_v23 = vadd.f32 %v108_v22, %v107_v21 }
  0x9a   :  { %136 = vpush %v109_v23 }
  0xc3   :  { %s135_s0 = spop %134 }
  0xc4   :  { %100 = sst [smem:[#allocation9]] %s135_s0 }
  0xcb   :  { %s137_s23 = spop %136 }
  0xcc   :  { %112 = sst [smem:[#allocation9 + $0x1]] %s137_s23 }
  0xcd   :  { %121 = dma.smem_to_hbm %s213_s24, 16, %s119_s22, [#allocation6]  }
  0xce   :  { %207 = dma.done.wait [#allocation6], 16  }
  0xcf   :  { %208 = vsyncadd [#allocation6], 4294967280 }
  0xd0   :  { %126 = sfence }
  0xd1   :  { %127 = vsyncpa [#allocation5], 1 }
  0xd2   :  { %128 = vsyncpa [#allocation8], 1 }
  0xd3   :  { %129 = vsyncpa [#allocation6], 1 }

</bundles_post_ra>
